<compile_context>
chip_gen: v7x
topology: tpu7x:2x2x1
jax: 0.10.0
libtpu: 0.0.40
codegen_flags: <defaults>
</compile_context>

<pallas_src>
import jax
import jax.numpy as jnp
from jax.experimental import pallas as pl
from jax.experimental.pallas import tpu as pltpu

LANES = 128  # one vreg of lanes; everything in-kernel is a lane-dense [B,128] slab


# ------------------------------ Pallas kernel --------------------------------


def fused_model_kernel(x_ref, w_ref, v_ref, o_ref):
    """TorchCustomModel trunk + policy/Q heads, all on lane-dense [B,128] slabs."""
    f32 = jnp.float32
    x = x_ref[...]          # [B,128] f32: obs[:, -2:] at lanes [0,2), actions at [no,no+ad)
    v = v_ref[...]          # [16,128] f32 row vectors (biases / clips / scales / masks)

    def clip(a, lo, hi):
        return jnp.minimum(jnp.maximum(a, lo), hi)

    def mm(a, seg):         # [B,128] @ packed [128,128] weight segment, bf16 MXU, f32 acc
        w = w_ref[seg * LANES:(seg + 1) * LANES, :]
        return jnp.dot(a.astype(w_ref.dtype), w, preferred_element_type=f32)

    # ---- trunk: obs2 -> FC(tanh) -> FC(tanh) -> logits -> Hardtanh(-3,3) = model_out
    t0 = jnp.tanh(mm(x, 0) + v[0:1, :])
    t1 = jnp.tanh(mm(t0, 1) + v[1:2, :])
    mo = clip(mm(t1, 2) + v[2:3, :], -3.0, 3.0)       # model_out in lanes [0,no), 0 elsewhere

    # ---- heads: both branches in one slab (policy hidden lanes [0,64), Q hidden [64,128))
    x0 = mo + v[11:12, :] * x                              # single merged layer-0 input
    h0 = clip(mm(x0, 3) + v[3:4, :], v[4:5, :], v[5:6, :])  # Hardtanh | ReLU per lane
    h1 = clip(mm(h0, 4) + v[6:7, :], v[4:5, :], v[5:6, :])
    o2 = mm(h1, 5) + v[7:8, :]                              # policy pre-squash / Q at out lanes

    # ---- single lane-dense output slab:
    #   model_out @ lanes [0,no), (range/2)*Hardtanh(.) @ [no,no+ad), Q @ lane no+ad
    o_ref[...] = v[10:11, :] * clip(o2, v[8:9, :], v[9:10, :]) + mo


# ------------------------------ host wrapper ----------------------------------


def make_forward(no, ad, lanes=LANES):
    """Returns jitted forward(obs, actions, W, V) -> (model_out, action, q)."""

    @jax.jit
    def forward(obs, actions, W, V):
        B = obs.shape[0]
        # Free layout plumbing: one lane-dense input slab (obs2 @ lanes [0,2),
        # actions @ lanes [no, no+ad)).
        x = jnp.zeros((B, lanes), jnp.float32)
        x = x.at[:, 0:2].set(obs[:, -2:].astype(jnp.float32))
        x = x.at[:, no:no + ad].set(actions.astype(jnp.float32))

        vmem = pl.BlockSpec(memory_space=pltpu.MemorySpace.VMEM)
        out = pl.pallas_call(
            fused_model_kernel,
            out_shape=jax.ShapeDtypeStruct((B, lanes), jnp.float32),
            in_specs=[vmem, vmem, vmem],
            out_specs=vmem,
        )(x, W, V)

        model_out = out[:, :no]
        pi = out[:, no:no + ad]
        q = out[:, no + ad:no + ad + 1]
        return model_out, pi, q

    return forward


# ---------------------------- parameter handling -------------------------------


def _uniform(key, shape, bound):
    return jax.random.uniform(key, shape, jnp.float32, minval=-bound, maxval=bound)


def _xavier(key, fan_in, fan_out):
    bound = (6.0 / (fan_in + fan_out)) ** 0.5
    return _uniform(key, (fan_in, fan_out), bound)


def init_params(key, num_outputs, action_dim, *, trunk_hiddens=(128, 128),
                actor_hiddens=(64, 64), critic_hiddens=(64, 64),
                action_low=-1.0, action_high=1.0):
    """Raw per-layer parameters (weights [in,out], biases [1,out])."""
    ks = list(jax.random.split(key, 18))
    t0, t1 = trunk_hiddens
    a0, a1 = actor_hiddens
    c0, c1 = critic_hiddens
    p = {
        # --- TorchCustomModel trunk (TorchFC tanh hiddens, Hardtanh(-3,3) on logits)
        "t_w0": _xavier(ks[0], 2, t0),            "t_b0": _uniform(ks[1], (1, t0), 0.1),
        "t_w1": _xavier(ks[2], t0, t1),           "t_b1": _uniform(ks[3], (1, t1), 0.1),
        "t_wl": _xavier(ks[4], t1, num_outputs),  "t_bl": _uniform(ks[5], (1, num_outputs), 0.1),
        # --- policy head
        "p_w0": _xavier(ks[6], num_outputs, a0),  "p_b0": _uniform(ks[7], (1, a0), 0.1),
        "p_w1": _xavier(ks[8], a0, a1),           "p_b1": _uniform(ks[9], (1, a1), 0.1),
        "p_w2": _xavier(ks[10], a1, action_dim),  "p_b2": _uniform(ks[11], (1, action_dim), 0.1),
        "action_range": jnp.full((1, action_dim), action_high - action_low, jnp.float32),
        # --- Q head (first layer split into obs / action parts; concat is exact)
        "q_b0": _uniform(ks[13], (1, c0), 0.1),
        "q_w1": _xavier(ks[14], c0, c1),          "q_b1": _uniform(ks[15], (1, c1), 0.1),
        "q_w2": _xavier(ks[16], c1, 1),           "q_b2": _uniform(ks[17], (1, 1), 0.1),
    }
    q_w0 = _xavier(ks[12], num_outputs + action_dim, c0)
    p["q_w0_obs"] = q_w0[:num_outputs]
    p["q_w0_act"] = q_w0[num_outputs:]
    return p


def pack_params(p, *, weight_dtype=jnp.bfloat16):
    """Coalesce all parameters into two contiguous VMEM buffers.

    W : [6*128, 128]  stacked matmul weights (bf16 -> single-pass MXU, half the DMA)
    V : [16, 128]     f32 row vectors: biases, per-lane clip bounds, scales, masks
    """
    L = LANES
    no, a0 = p["p_w0"].shape
    ad = p["p_w2"].shape[1]
    # --- packing assumptions (per review's correctness concerns) ---
    assert p["t_w1"].shape == (L, L), "trunk hidden widths must equal 128"
    assert p["q_w1"].shape == p["p_w1"].shape == (a0, a0) and 2 * a0 == L, \
        "actor/critic hidden widths must match and sum to 128 lanes"
    assert p["q_w0_obs"].shape == (no, a0) and p["q_w0_act"].shape == (ad, a0)
    assert no >= 2, "obs lanes [0,2) must not collide with action lanes [no,no+ad)"
    assert no + ad + 1 <= L, "model_out + action + Q must fit in one 128-lane slab"

    z = lambda: jnp.zeros((L, L), jnp.float32)
    T0 = z().at[0:2, :].set(p["t_w0"])                        # trunk layer 0 (obs2 rows)
    T1 = p["t_w1"]                                            # trunk layer 1
    TL = z().at[:, 0:no].set(p["t_wl"])                       # trunk logits -> lanes [0,no)
    H0 = (z().at[0:no, 0:a0].set(p["p_w0"])                   # heads layer 0 (merged dot)
             .at[0:no, a0:L].set(p["q_w0_obs"])
             .at[no:no + ad, a0:L].set(p["q_w0_act"]))
    H1 = (z().at[0:a0, 0:a0].set(p["p_w1"])                   # heads layer 1 (block-diag)
             .at[a0:L, a0:L].set(p["q_w1"]))
    H2 = (z().at[0:a0, no:no + ad].set(p["p_w2"])             # heads layer 2 -> output lanes
             .at[a0:L, no + ad:no + ad + 1].set(p["q_w2"]))
    W = jnp.concatenate([T0, T1, TL, H0, H1, H2], axis=0).astype(weight_dtype)

    zr = lambda: jnp.zeros((1, L), jnp.float32)
    rows = [
        p["t_b0"],                                                         # 0  trunk b0
        p["t_b1"],                                                         # 1  trunk b1
        zr().at[0:1, 0:no].set(p["t_bl"]),                                 # 2  trunk logits bias
        jnp.concatenate([p["p_b0"], p["q_b0"]], axis=1),                   # 3  heads b0
        jnp.concatenate([jnp.full((1, a0), -1.0),                          # 4  lo: Hardtanh|ReLU
                         jnp.zeros((1, a0))], axis=1),
        jnp.concatenate([jnp.full((1, a0), 1.0),                           # 5  hi: Hardtanh|ReLU
                         jnp.full((1, a0), jnp.inf)], axis=1),
        jnp.concatenate([p["p_b1"], p["q_b1"]], axis=1),                   # 6  heads b1
        (zr().at[0:1, no:no + ad].set(p["p_b2"])                           # 7  heads b2 @ out lanes
             .at[0:1, no + ad:no + ad + 1].set(p["q_b2"])),
        jnp.full((1, L), -jnp.inf).at[0:1, no:no + ad].set(-1.0),          # 8  final lo
        jnp.full((1, L), jnp.inf).at[0:1, no:no + ad].set(1.0),            # 9  final hi
        (zr().at[0:1, no:no + ad].set(p["action_range"] * 0.5)             # 10 final scale (/2 folded)
             .at[0:1, no + ad:no + ad + 1].set(1.0)),
        zr().at[0:1, no:no + ad].set(1.0),                                 # 11 action injection mask
    ]
    V = jnp.concatenate(rows + [jnp.zeros((16 - len(rows), L), jnp.float32)], axis=0)
    return {"W": W, "V": V.astype(jnp.float32)}


# --------------------------------- reference -----------------------------------


def reference(obs, actions, p):
    """Pure-JAX f32 reference: TorchCustomModel trunk + policy head + Q head."""
    obs2 = obs[:, -2:]
    t0 = jnp.tanh(obs2 @ p["t_w0"] + p["t_b0"])
    t1 = jnp.tanh(t0 @ p["t_w1"] + p["t_b1"])
    mo = jnp.clip(t1 @ p["t_wl"] + p["t_bl"], -3.0, 3.0)        # model_out

    h = jnp.clip(mo @ p["p_w0"] + p["p_b0"], -1.0, 1.0)
    h = jnp.clip(h @ p["p_w1"] + p["p_b1"], -1.0, 1.0)
    pi = p["action_range"] * jnp.clip(h @ p["p_w2"] + p["p_b2"], -1.0, 1.0) / 2.0

    g = jax.nn.relu(mo @ p["q_w0_obs"] + actions @ p["q_w0_act"] + p["q_b0"])
    g = jax.nn.relu(g @ p["q_w1"] + p["q_b1"])
    q = g @ p["q_w2"] + p["q_b2"]
    return mo, pi, q


# ----------------------------------- main ---------------------------------------


if __name__ == "__main__":
    B = 2             # batch
    OBS_DIM = 4       # raw env obs width; the model uses obs[:, -2:] per the spec
    NUM_OUTPUTS = 32  # TorchFC logits width (model_out)
    ACTION_DIM = 2    # continuous action dim

    key = jax.random.PRNGKey(0)
    kp, ko, ka = jax.random.split(key, 3)

    params = init_params(kp, NUM_OUTPUTS, ACTION_DIM, action_low=-2.0, action_high=2.0)
    packed = pack_params(params, weight_dtype=jnp.bfloat16)   # f32 also supported

    obs = jax.random.normal(ko, (B, OBS_DIM), jnp.float32)
    actions = jax.random.uniform(ka, (B, ACTION_DIM), jnp.float32, minval=-1.0, maxval=1.0)

    forward = make_forward(NUM_OUTPUTS, ACTION_DIM)
    mo, pi, q = jax.block_until_ready(forward(obs, actions, packed["W"], packed["V"]))

    # correctness check vs. pure-JAX reference on the raw (unpacked, f32) params
    mo_r, pi_r, q_r = reference(obs, actions, params)
    assert mo.shape == (B, NUM_OUTPUTS) and pi.shape == (B, ACTION_DIM) and q.shape == (B, 1)
    tol = 5e-2 if packed["W"].dtype == jnp.bfloat16 else 1e-5   # bf16 MXU weights
    assert jnp.allclose(mo, mo_r, atol=tol), (mo, mo_r)
    assert jnp.allclose(pi, pi_r, atol=tol), (pi, pi_r)
    assert jnp.allclose(q, q_r, atol=tol), (q, q_r)

    print("KERNEL_OK")
</pallas_src>

<mosaic_0001>
module attributes {stable_mosaic.version = 11 : i64} {
  func.func @fused_model_kernel(%arg0: memref<2x128xf32, #tpu.memory_space<vmem>>, %arg1: memref<768x128xbf16, #tpu.memory_space<vmem>>, %arg2: memref<16x128xf32, #tpu.memory_space<vmem>>, %arg3: memref<2x128xf32, #tpu.memory_space<vmem>>) attributes {dimension_semantics = [], scalar_prefetch = 0 : i64, scratch_operands = 0 : i64, tpu.core_type = #tpu.core_type<tc>} {
    %c0 = arith.constant 0 : index
    %c0_0 = arith.constant 0 : index
    %0 = vector.load %arg0[%c0, %c0_0] : memref<2x128xf32, #tpu.memory_space<vmem>>, vector<2x128xf32>
    %c0_1 = arith.constant 0 : index
    %c0_2 = arith.constant 0 : index
    %1 = vector.load %arg2[%c0_1, %c0_2] : memref<16x128xf32, #tpu.memory_space<vmem>>, vector<16x128xf32>
    %c0_3 = arith.constant 0 : index
    %c0_4 = arith.constant 0 : index
    %2 = vector.load %arg1[%c0_3, %c0_4] : memref<768x128xbf16, #tpu.memory_space<vmem>>, vector<128x128xbf16>
    %3 = arith.truncf %0 : vector<2x128xf32> to vector<2x128xbf16>
    %cst = arith.constant dense<0.000000e+00> : vector<2x128xf32>
    %4 = tpu.matmul %3, %2, %cst {dimension_numbers = #tpu.dot_dimension_numbers<[1], [0], [0], [1], [0, 0, 1, 1], [], []>} : vector<2x128xbf16>, vector<128x128xbf16>, vector<2x128xf32> -> vector<2x128xf32>
    %5 = vector.extract_strided_slice %1 {offsets = [0, 0], sizes = [1, 128], strides = [1, 1]} : vector<16x128xf32> to vector<1x128xf32>
    %6 = vector.broadcast %5 : vector<1x128xf32> to vector<2x128xf32>
    %7 = arith.addf %4, %6 : vector<2x128xf32>
    %8 = math.tanh %7 : vector<2x128xf32>
    %c128 = arith.constant 128 : index
    %c0_5 = arith.constant 0 : index
    %9 = vector.load %arg1[%c128, %c0_5] : memref<768x128xbf16, #tpu.memory_space<vmem>>, vector<128x128xbf16>
    %10 = arith.truncf %8 : vector<2x128xf32> to vector<2x128xbf16>
    %cst_6 = arith.constant dense<0.000000e+00> : vector<2x128xf32>
    %11 = tpu.matmul %10, %9, %cst_6 {dimension_numbers = #tpu.dot_dimension_numbers<[1], [0], [0], [1], [0, 0, 1, 1], [], []>} : vector<2x128xbf16>, vector<128x128xbf16>, vector<2x128xf32> -> vector<2x128xf32>
    %12 = vector.extract_strided_slice %1 {offsets = [1, 0], sizes = [1, 128], strides = [1, 1]} : vector<16x128xf32> to vector<1x128xf32>
    %13 = vector.broadcast %12 : vector<1x128xf32> to vector<2x128xf32>
    %14 = arith.addf %11, %13 : vector<2x128xf32>
    %15 = math.tanh %14 : vector<2x128xf32>
    %c256 = arith.constant 256 : index
    %c0_7 = arith.constant 0 : index
    %16 = vector.load %arg1[%c256, %c0_7] : memref<768x128xbf16, #tpu.memory_space<vmem>>, vector<128x128xbf16>
    %17 = arith.truncf %15 : vector<2x128xf32> to vector<2x128xbf16>
    %cst_8 = arith.constant dense<0.000000e+00> : vector<2x128xf32>
    %18 = tpu.matmul %17, %16, %cst_8 {dimension_numbers = #tpu.dot_dimension_numbers<[1], [0], [0], [1], [0, 0, 1, 1], [], []>} : vector<2x128xbf16>, vector<128x128xbf16>, vector<2x128xf32> -> vector<2x128xf32>
    %19 = vector.extract_strided_slice %1 {offsets = [2, 0], sizes = [1, 128], strides = [1, 1]} : vector<16x128xf32> to vector<1x128xf32>
    %20 = vector.broadcast %19 : vector<1x128xf32> to vector<2x128xf32>
    %21 = arith.addf %18, %20 : vector<2x128xf32>
    %cst_9 = arith.constant -3.000000e+00 : f32
    %22 = vector.broadcast %cst_9 : f32 to vector<2x128xf32>
    %23 = arith.maximumf %21, %22 : vector<2x128xf32>
    %cst_10 = arith.constant 3.000000e+00 : f32
    %24 = vector.broadcast %cst_10 : f32 to vector<2x128xf32>
    %25 = arith.minimumf %23, %24 : vector<2x128xf32>
    %26 = vector.extract_strided_slice %1 {offsets = [11, 0], sizes = [1, 128], strides = [1, 1]} : vector<16x128xf32> to vector<1x128xf32>
    %27 = vector.broadcast %26 : vector<1x128xf32> to vector<2x128xf32>
    %28 = arith.mulf %27, %0 : vector<2x128xf32>
    %29 = arith.addf %25, %28 : vector<2x128xf32>
    %c384 = arith.constant 384 : index
    %c0_11 = arith.constant 0 : index
    %30 = vector.load %arg1[%c384, %c0_11] : memref<768x128xbf16, #tpu.memory_space<vmem>>, vector<128x128xbf16>
    %31 = arith.truncf %29 : vector<2x128xf32> to vector<2x128xbf16>
    %cst_12 = arith.constant dense<0.000000e+00> : vector<2x128xf32>
    %32 = tpu.matmul %31, %30, %cst_12 {dimension_numbers = #tpu.dot_dimension_numbers<[1], [0], [0], [1], [0, 0, 1, 1], [], []>} : vector<2x128xbf16>, vector<128x128xbf16>, vector<2x128xf32> -> vector<2x128xf32>
    %33 = vector.extract_strided_slice %1 {offsets = [3, 0], sizes = [1, 128], strides = [1, 1]} : vector<16x128xf32> to vector<1x128xf32>
    %34 = vector.broadcast %33 : vector<1x128xf32> to vector<2x128xf32>
    %35 = arith.addf %32, %34 : vector<2x128xf32>
    %36 = vector.extract_strided_slice %1 {offsets = [4, 0], sizes = [1, 128], strides = [1, 1]} : vector<16x128xf32> to vector<1x128xf32>
    %37 = vector.extract_strided_slice %1 {offsets = [5, 0], sizes = [1, 128], strides = [1, 1]} : vector<16x128xf32> to vector<1x128xf32>
    %38 = vector.broadcast %36 : vector<1x128xf32> to vector<2x128xf32>
    %39 = arith.maximumf %35, %38 : vector<2x128xf32>
    %40 = vector.broadcast %37 : vector<1x128xf32> to vector<2x128xf32>
    %41 = arith.minimumf %39, %40 : vector<2x128xf32>
    %c512 = arith.constant 512 : index
    %c0_13 = arith.constant 0 : index
    %42 = vector.load %arg1[%c512, %c0_13] : memref<768x128xbf16, #tpu.memory_space<vmem>>, vector<128x128xbf16>
    %43 = arith.truncf %41 : vector<2x128xf32> to vector<2x128xbf16>
    %cst_14 = arith.constant dense<0.000000e+00> : vector<2x128xf32>
    %44 = tpu.matmul %43, %42, %cst_14 {dimension_numbers = #tpu.dot_dimension_numbers<[1], [0], [0], [1], [0, 0, 1, 1], [], []>} : vector<2x128xbf16>, vector<128x128xbf16>, vector<2x128xf32> -> vector<2x128xf32>
    %45 = vector.extract_strided_slice %1 {offsets = [6, 0], sizes = [1, 128], strides = [1, 1]} : vector<16x128xf32> to vector<1x128xf32>
    %46 = vector.broadcast %45 : vector<1x128xf32> to vector<2x128xf32>
    %47 = arith.addf %44, %46 : vector<2x128xf32>
    %48 = vector.extract_strided_slice %1 {offsets = [4, 0], sizes = [1, 128], strides = [1, 1]} : vector<16x128xf32> to vector<1x128xf32>
    %49 = vector.extract_strided_slice %1 {offsets = [5, 0], sizes = [1, 128], strides = [1, 1]} : vector<16x128xf32> to vector<1x128xf32>
    %50 = vector.broadcast %48 : vector<1x128xf32> to vector<2x128xf32>
    %51 = arith.maximumf %47, %50 : vector<2x128xf32>
    %52 = vector.broadcast %49 : vector<1x128xf32> to vector<2x128xf32>
    %53 = arith.minimumf %51, %52 : vector<2x128xf32>
    %c640 = arith.constant 640 : index
    %c0_15 = arith.constant 0 : index
    %54 = vector.load %arg1[%c640, %c0_15] : memref<768x128xbf16, #tpu.memory_space<vmem>>, vector<128x128xbf16>
    %55 = arith.truncf %53 : vector<2x128xf32> to vector<2x128xbf16>
    %cst_16 = arith.constant dense<0.000000e+00> : vector<2x128xf32>
    %56 = tpu.matmul %55, %54, %cst_16 {dimension_numbers = #tpu.dot_dimension_numbers<[1], [0], [0], [1], [0, 0, 1, 1], [], []>} : vector<2x128xbf16>, vector<128x128xbf16>, vector<2x128xf32> -> vector<2x128xf32>
    %57 = vector.extract_strided_slice %1 {offsets = [7, 0], sizes = [1, 128], strides = [1, 1]} : vector<16x128xf32> to vector<1x128xf32>
    %58 = vector.broadcast %57 : vector<1x128xf32> to vector<2x128xf32>
    %59 = arith.addf %56, %58 : vector<2x128xf32>
    %60 = vector.extract_strided_slice %1 {offsets = [10, 0], sizes = [1, 128], strides = [1, 1]} : vector<16x128xf32> to vector<1x128xf32>
    %61 = vector.extract_strided_slice %1 {offsets = [8, 0], sizes = [1, 128], strides = [1, 1]} : vector<16x128xf32> to vector<1x128xf32>
    %62 = vector.extract_strided_slice %1 {offsets = [9, 0], sizes = [1, 128], strides = [1, 1]} : vector<16x128xf32> to vector<1x128xf32>
    %63 = vector.broadcast %61 : vector<1x128xf32> to vector<2x128xf32>
    %64 = arith.maximumf %59, %63 : vector<2x128xf32>
    %65 = vector.broadcast %62 : vector<1x128xf32> to vector<2x128xf32>
    %66 = arith.minimumf %64, %65 : vector<2x128xf32>
    %67 = vector.broadcast %60 : vector<1x128xf32> to vector<2x128xf32>
    %68 = arith.mulf %67, %66 : vector<2x128xf32>
    %69 = arith.addf %68, %25 : vector<2x128xf32>
    %c0_17 = arith.constant 0 : index
    %c0_18 = arith.constant 0 : index
    %70 = vector.load %arg3[%c0_17, %c0_18] : memref<2x128xf32, #tpu.memory_space<vmem>>, vector<2x128xf32>
    tpu.vector_store %arg3[%c0_17, %c0_18], %69 {strides = array<i32>} : memref<2x128xf32, #tpu.memory_space<vmem>>, vector<2x128xf32>,
    return
  }
}

</mosaic_0001>

<bundles_post_ra>
// kernel: forward.1
= control target key start
LH: loop header
LB: loop body
LE: loop exit
PB: predicated region body
PF: predicated region fallthrough
CT: control target
= control target key end

     0   :  { %8 = vsyncpa [#allocation3], 0  ;;  %s1034_s12 = smov [#allocation2]   ;;  %s1193_s0 = inlined_call_operand.vmem [shape: f32[2,128], index: 0, kind: input, shape index: {}]   ;;  %s1194_s1 = inlined_call_operand.hbm [shape: bf16[768,128], index: 1, kind: input, shape index: {}]   ;;  %s1195_s2 = inlined_call_operand.vmem [shape: f32[16,128], index: 2, kind: input, shape index: {}]   ;;  %s1196_s3 = inlined_call_operand.vmem [shape: f32[2,128], index: 3, kind: output, shape index: {}]  }
   0x1   :  { %s16_s13 = sshll.u32 %s1034_s12, 4  ;;  %s1010_s16 = scalar_lea.hbm %s1194_s1, 6144  ;;  %s17_s13 = int_to_ptr.vmem [resolvable:$true] %s16_s13 }
   0x2   :  { %p1011_p0 = scmp.ne.s32.totalorder %s1194_s1, %s1010_s16  ;;  %p1014_p1 = scmp.lt.u32.totalorder %s1010_s16, %s1194_s1 }
   0x4   :  { %p1016_p2 = pnand %p1014_p1, %p1011_p0 }
   0x6   :  { %1019 = shalt.err (!%p1016_p2)
}
   0x7   :  { %s1020_s21 = scalar_lea.vmem %s17_s13, 6144  ;;  %p1025_p4 = scmp.lt.s32.totalorder %s17_s13, %s17_s13 }
   0x8   :  { %p1021_p3 = scmp.ne.s32.totalorder %s17_s13, %s1020_s21  ;;  %p1026_p5 = scmp.lt.s32.totalorder %s1020_s21, %s1020_s21 }
   0xa   :  { %p1027_p6 = por %p1026_p5, %p1025_p4 }
   0xc   :  { %p1028_p7 = pnand %p1027_p6, %p1021_p3 }
   0xe   :  { %1031 = shalt.err (!%p1028_p7)
}
   0xf   :  { %s1035_s22 = smov 64   ;;  %s1036_s23 = smov 4  }
  0x10   :  { %22 = dma.hbm_to_vmem [thread:$0]  %s1194_s1, 6144, %s17_s13, [#allocation3], %s1035_s22, %s1035_s22, %s1036_s23  }
  0x11   :  { %1032 = dma.done.wait [#allocation3], 6144  }
  0x12   :  { %1033 = vsyncadd [#allocation3], 4294961152  ;;  %v1037_v0 = vmov 0.0   ;;  %vm1038_vm0 = vmmov 0   ;;  %v958_v1 = vld [vmem:[#allocation2] sm:$0xff]   ;;  %v959_v2 = vld [vmem:[#allocation2 + $0x8] sm:$0xff]   ;;  %v49_v23 = vlaneseq }
  0x13   :  { %833 = vmatprep.subr.bf16.mxu0 %v1037_v0  ;;  %849 = vmatprep.mubr.msk.bf16.mxu0 %vm1038_vm0, %v1037_v0  ;;  %v960_v3 = vld [vmem:[#allocation2 + $0x10] sm:$0xff]   ;;  %v966_v4 = vld [vmem:[#allocation2 + $0x40] sm:$0xff]   ;;  %v961_v5 = vld [vmem:[#allocation2 + $0x18] sm:$0xff]  }
  0x14   :  { %853 = vmatprep.subr.bf16.mxu1 %v1037_v0  ;;  %869 = vmatprep.mubr.msk.bf16.mxu1 %vm1038_vm0, %v1037_v0  ;;  %v967_v6 = vld [vmem:[#allocation2 + $0x48] sm:$0xff]   ;;  %v962_v7 = vld [vmem:[#allocation2 + $0x20] sm:$0xff]   ;;  %v968_v8 = vld [vmem:[#allocation2 + $0x50] sm:$0xff]   ;;  %v1106_v24 = vshrl.u32 %v49_v23, 7 }
  0x15   :  { %834 = vmatpush3.bf16.msra.mxu0 %v958_v1  ;;  %854 = vmatpush3.bf16.msra.mxu1 %v966_v4  ;;  %v963_v9 = vld [vmem:[#allocation2 + $0x28] sm:$0xff]   ;;  %v969_v10 = vld [vmem:[#allocation2 + $0x58] sm:$0xff]   ;;  %v964_v11 = vld [vmem:[#allocation2 + $0x30] sm:$0xff]  }
  0x16   :  { %835 = vmatprep.subr.bf16.mxu0 %v1037_v0  ;;  %855 = vmatprep.subr.bf16.mxu1 %v1037_v0  ;;  %v965_v12 = vld [vmem:[#allocation2 + $0x38] sm:$0xff]   ;;  %v1089_v13 = vld [vmem:[%s1193_s0] sm:$0x3]  ;;  %v971_v16 = vld [vmem:[#allocation2 + $0x68] sm:$0xff]   ;;  %v51_v25 = vsub.s32 0, %v1106_v24  ;;  %v161_v45 = vsub.s32 1, %v1106_v24 }
  0x17   :  { %v48_v14 = vpack.c.bf16 %v1089_v13, %v1089_v13  ;;  %v970_v15 = vld [vmem:[#allocation2 + $0x60] sm:$0xff]   ;;  %v972_v17 = vld [vmem:[#allocation2 + $0x70] sm:$0xff]   ;;  %v973_v18 = vld [vmem:[#allocation2 + $0x78] sm:$0xff]   ;;  %v271_v62 = vsub.s32 2, %v1106_v24  ;;  %v365_v63 = vsub.s32 3, %v1106_v24  ;;  %v485_v23 = vsub.s32 5, %v1106_v24 }
  0x18   :  { %v974_v19 = vld [vmem:[#allocation2 + $0x80] sm:$0xff]   ;;  %v975_v20 = vld [vmem:[#allocation2 + $0x88] sm:$0xff]   ;;  %v976_v21 = vld [vmem:[#allocation2 + $0x90] sm:$0xff]  }
  0x19   :  { %836 = vmatpush3.bf16.msra.mxu0 %v959_v2  ;;  %856 = vmatpush3.bf16.msra.mxu1 %v967_v6  ;;  %v977_v22 = vld [vmem:[#allocation2 + $0x98] sm:$0xff]   ;;  %v1112_v26 = vld [vmem:[%s1195_s2] sm:$0xff]  ;;  %v979_v36 = vld [vmem:[#allocation2 + $0xa8] sm:$0xff]  }
  0x1a   :  { %837 = vmatprep.subr.bf16.mxu0 %v1037_v0  ;;  %857 = vmatprep.subr.bf16.mxu1 %v1037_v0  ;;  %v52_v27 = vrot.slane %v1112_v26, %v51_v25  ;;  %v978_v35 = vld [vmem:[#allocation2 + $0xa0] sm:$0xff]   ;;  %v980_v37 = vld [vmem:[#allocation2 + $0xb0] sm:$0xff]   ;;  %v981_v38 = vld [vmem:[#allocation2 + $0xb8] sm:$0xff]   ;;  %v162_v46 = vrot.slane %v1112_v26, %v161_v45  ;;  %v272_v2 = vrot.slane %v1112_v26, %v271_v62 }
  0x1b   :  { %v982_v39 = vld [vmem:[#allocation2 + $0xc0] sm:$0xff]   ;;  %v983_v40 = vld [vmem:[#allocation2 + $0xc8] sm:$0xff]   ;;  %v984_v41 = vld [vmem:[#allocation2 + $0xd0] sm:$0xff]  }
  0x1c   :  { %v985_v42 = vld [vmem:[#allocation2 + $0xd8] sm:$0xff]   ;;  %v986_v43 = vld [vmem:[#allocation2 + $0xe0] sm:$0xff]   ;;  %v987_v44 = vld [vmem:[#allocation2 + $0xe8] sm:$0xff]  }
  0x1d   :  { %838 = vmatpush3.bf16.msra.mxu0 %v960_v3  ;;  %858 = vmatpush3.bf16.msra.mxu1 %v968_v8  ;;  %v988_v54 = vld [vmem:[#allocation2 + $0xf0] sm:$0xff]   ;;  %v989_v55 = vld [vmem:[#allocation2 + $0xf8] sm:$0xff]   ;;  %v990_v56 = vld [vmem:[#allocation2 + $0x100] sm:$0xff]  }
  0x1e   :  { %839 = vmatprep.subr.bf16.mxu0 %v1037_v0  ;;  %859 = vmatprep.subr.bf16.mxu1 %v1037_v0  ;;  %v991_v57 = vld [vmem:[#allocation2 + $0x108] sm:$0xff]   ;;  %v992_v58 = vld [vmem:[#allocation2 + $0x110] sm:$0xff]   ;;  %v993_v59 = vld [vmem:[#allocation2 + $0x118] sm:$0xff]  }
  0x1f   :  { %v994_v60 = vld [vmem:[#allocation2 + $0x120] sm:$0xff]   ;;  %v995_v61 = vld [vmem:[#allocation2 + $0x128] sm:$0xff]  }
  0x20   :  { %v1148_v1 = vld [vmem:[%s1195_s2 + $0x8] sm:$0xff] }
  0x21   :  { %840 = vmatpush3.bf16.msra.mxu0 %v961_v5  ;;  %860 = vmatpush3.bf16.msra.mxu1 %v969_v10  ;;  %v366_v3 = vrot.slane %v1148_v1, %v365_v63 }
  0x22   :  { %841 = vmatprep.subr.bf16.mxu0 %v1037_v0  ;;  %861 = vmatprep.subr.bf16.mxu1 %v1037_v0 }
  0x23   :  { %v367_v6 = vmul.f32 %v366_v3, %v1089_v13  ;;  %v998_v13 = vld [vmem:[#allocation2 + $0x140] sm:$0xff]  }
  0x25   :  { %842 = vmatpush3.bf16.msra.mxu0 %v962_v7  ;;  %862 = vmatpush3.bf16.msra.mxu1 %v970_v15  ;;  %v997_v15 = vld [vmem:[#allocation2 + $0x138] sm:$0xff]  }
  0x26   :  { %843 = vmatprep.subr.bf16.mxu0 %v1037_v0  ;;  %863 = vmatprep.subr.bf16.mxu1 %v1037_v0 }
  0x29   :  { %844 = vmatpush3.bf16.msra.mxu0 %v963_v9  ;;  %864 = vmatpush3.bf16.msra.mxu1 %v971_v16  ;;  %v999_v16 = vld [vmem:[#allocation2 + $0x148] sm:$0xff]  }
  0x2a   :  { %845 = vmatprep.subr.bf16.mxu0 %v1037_v0  ;;  %865 = vmatprep.subr.bf16.mxu1 %v1037_v0 }
  0x2d   :  { %846 = vmatpush3.bf16.msra.mxu0 %v964_v11  ;;  %866 = vmatpush3.bf16.msra.mxu1 %v972_v17  ;;  %v1000_v17 = vld [vmem:[#allocation2 + $0x150] sm:$0xff]  }
  0x2e   :  { %847 = vmatprep.subr.bf16.mxu0 %v1037_v0  ;;  %867 = vmatprep.subr.bf16.mxu1 %v1037_v0 }
  0x31   :  { %848 = vmatpush3.bf16.msra.mxu0 %v965_v12  ;;  %868 = vmatpush3.bf16.msra.mxu1 %v973_v18  ;;  %v1001_v18 = vld [vmem:[#allocation2 + $0x158] sm:$0xff]  }
  0x32   :  { %873 = vmatprep.subr.bf16.mxu0 %v1037_v0  ;;  %893 = vmatprep.subr.bf16.mxu1 %v1037_v0 }
  0x34   :  { %850 = vmatmul.mubr.bf16.vlgmr.msra.gmra.mrb[0].mxu0 %v48_v14  ;;  %v996_v14 = vld [vmem:[#allocation2 + $0x130] sm:$0xff]  }
  0x35   :  { %889 = vmatprep.mubr.msk.bf16.mxu0 %vm1038_vm0, %v1037_v0  ;;  %874 = vmatpush3.bf16.msra.mxu0 %v974_v19  ;;  %v1002_v19 = vld [vmem:[#allocation2 + $0x160] sm:$0xff]  }
  0x36   :  { %875 = vmatprep.subr.bf16.mxu0 %v1037_v0 }
  0x39   :  { %876 = vmatpush3.bf16.msra.mxu0 %v975_v20  ;;  %v1003_v20 = vld [vmem:[#allocation2 + $0x168] sm:$0xff]  }
  0x3a   :  { %877 = vmatprep.subr.bf16.mxu0 %v1037_v0 }
  0x3d   :  { %878 = vmatpush3.bf16.msra.mxu0 %v976_v21  ;;  %v480_v21 = vsub.s32 4, %v1106_v24 }
  0x3e   :  { %879 = vmatprep.subr.bf16.mxu0 %v1037_v0 }
  0x41   :  { %880 = vmatpush3.bf16.msra.mxu0 %v977_v22  ;;  %v389_v22 = vrot.slane %v1112_v26, %v365_v63 }
  0x42   :  { %881 = vmatprep.subr.bf16.mxu0 %v1037_v0 }
  0x45   :  { %882 = vmatpush3.bf16.msra.mxu0 %v978_v35 }
  0x46   :  { %883 = vmatprep.subr.bf16.mxu0 %v1037_v0 }
  0x49   :  { %884 = vmatpush3.bf16.msra.mxu0 %v979_v36 }
  0x4a   :  { %885 = vmatprep.subr.bf16.mxu0 %v1037_v0 }
  0x4d   :  { %886 = vmatpush3.bf16.msra.mxu0 %v980_v37  ;;  %v1004_v37 = vld [vmem:[#allocation2 + $0x170] sm:$0xff]  }
  0x4e   :  { %887 = vmatprep.subr.bf16.mxu0 %v1037_v0 }
  0x51   :  { %888 = vmatpush3.bf16.msra.mxu0 %v981_v38  ;;  %v1005_v38 = vld [vmem:[#allocation2 + $0x178] sm:$0xff]  }
  0x52   :  { %913 = vmatprep.subr.bf16.mxu0 %v1037_v0 }
 0x107   :  { %v135_v28 = vpop.f32.mrb[0].mxu0 }
 0x108   :  { %v136_v29 = vadd.f32 %v135_v28, %v52_v27  ;;  %v851_v30 = vpop.f32.mrb[1].mxu0  ;;  %v481_v27 = vrot.slane %v1112_v26, %v480_v21 }
 0x109   :  { %v138_v31 = vpop.f32.mrb[2].mxu0  ;;  %v486_v30 = vrot.slane %v1112_v26, %v485_v23 }
 0x10a   :  { %1006 = vtanh.f32 %v136_v29  ;;  %v852_v32 = vpop.f32.mrb[3].mxu0 }
 0x114   :  { %v1007_v33 = vpop.eup %1006 }
 0x115   :  { %v158_v34 = vpack.c.bf16 %v1007_v33, %v1007_v33 }
 0x117   :  { %870 = vmatmul.mubr.bf16.vlgmr.msra.gmra.mrb[0].mxu1 %v158_v34 }
 0x118   :  { %909 = vmatprep.mubr.msk.bf16.mxu1 %vm1038_vm0, %v1037_v0  ;;  %894 = vmatpush3.bf16.msra.mxu1 %v982_v39  ;;  %v507_v39 = vsub.s32 6, %v1106_v24 }
 0x119   :  { %895 = vmatprep.subr.bf16.mxu1 %v1037_v0 }
 0x11c   :  { %896 = vmatpush3.bf16.msra.mxu1 %v983_v40  ;;  %v508_v40 = vrot.slane %v1112_v26, %v507_v39 }
 0x11d   :  { %897 = vmatprep.subr.bf16.mxu1 %v1037_v0 }
 0x120   :  { %898 = vmatpush3.bf16.msra.mxu1 %v984_v41 }
 0x121   :  { %899 = vmatprep.subr.bf16.mxu1 %v1037_v0 }
 0x124   :  { %900 = vmatpush3.bf16.msra.mxu1 %v985_v42 }
 0x125   :  { %901 = vmatprep.subr.bf16.mxu1 %v1037_v0 }
 0x128   :  { %902 = vmatpush3.bf16.msra.mxu1 %v986_v43 }
 0x129   :  { %903 = vmatprep.subr.bf16.mxu1 %v1037_v0 }
 0x12c   :  { %904 = vmatpush3.bf16.msra.mxu1 %v987_v44 }
 0x12d   :  { %905 = vmatprep.subr.bf16.mxu1 %v1037_v0 }
 0x130   :  { %906 = vmatpush3.bf16.msra.mxu1 %v988_v54  ;;  %v716_v54 = vrot.slane %v1148_v1, %v161_v45 }
 0x131   :  { %907 = vmatprep.subr.bf16.mxu1 %v1037_v0 }
 0x134   :  { %908 = vmatpush3.bf16.msra.mxu1 %v989_v55 }
 0x135   :  { %933 = vmatprep.subr.bf16.mxu1 %v1037_v0 }
 0x1ea   :  { %v245_v47 = vpop.f32.mrb[0].mxu1 }
 0x1eb   :  { %v246_v48 = vadd.f32 %v245_v47, %v162_v46  ;;  %v871_v49 = vpop.f32.mrb[1].mxu1 }
 0x1ec   :  { %v248_v50 = vpop.f32.mrb[2].mxu1 }
 0x1ed   :  { %1008 = vtanh.f32 %v246_v48  ;;  %v872_v51 = vpop.f32.mrb[3].mxu1  ;;  %v618_v50 = vsub.s32 7, %v1106_v24 }
 0x1ef   :  { %v619_v51 = vrot.slane %v1112_v26, %v618_v50 }
 0x1f7   :  { %v1009_v52 = vpop.eup %1008 }
 0x1f8   :  { %v268_v53 = vpack.c.bf16 %v1009_v52, %v1009_v52 }
 0x1fa   :  { %890 = vmatmul.mubr.bf16.vlgmr.msra.gmra.mrb[4].mxu0 %v268_v53 }
 0x1fb   :  { %929 = vmatprep.mubr.msk.bf16.mxu0 %vm1038_vm0, %v1037_v0  ;;  %914 = vmatpush3.bf16.msra.mxu0 %v990_v56 }
 0x1fc   :  { %915 = vmatprep.subr.bf16.mxu0 %v1037_v0 }
 0x1ff   :  { %916 = vmatpush3.bf16.msra.mxu0 %v991_v57  ;;  %v721_v57 = vrot.slane %v1148_v1, %v271_v62 }
 0x200   :  { %917 = vmatprep.subr.bf16.mxu0 %v1037_v0 }
 0x203   :  { %918 = vmatpush3.bf16.msra.mxu0 %v992_v58 }
 0x204   :  { %919 = vmatprep.subr.bf16.mxu0 %v1037_v0 }
 0x207   :  { %920 = vmatpush3.bf16.msra.mxu0 %v993_v59 }
 0x208   :  { %921 = vmatprep.subr.bf16.mxu0 %v1037_v0 }
 0x20b   :  { %922 = vmatpush3.bf16.msra.mxu0 %v994_v60 }
 0x20c   :  { %923 = vmatprep.subr.bf16.mxu0 %v1037_v0 }
 0x20f   :  { %924 = vmatpush3.bf16.msra.mxu0 %v995_v61 }
 0x210   :  { %925 = vmatprep.subr.bf16.mxu0 %v1037_v0 }
 0x213   :  { %926 = vmatpush3.bf16.msra.mxu0 %v996_v14 }
 0x214   :  { %927 = vmatprep.subr.bf16.mxu0 %v1037_v0 }
 0x217   :  { %928 = vmatpush3.bf16.msra.mxu0 %v997_v15 }
 0x2cd   :  { %v355_v4 = vpop.f32.mrb[4].mxu0 }
 0x2ce   :  { %v1154_v5 = vadd.f32 %v355_v4, %v272_v2  ;;  %v891_v7 = vpop.f32.mrb[5].mxu0 }
 0x2cf   :  { %v358_v8 = vpop.f32.mrb[6].mxu0 }
 0x2d0   :  { %v754_v9 = vclamps-f32 %v1154_v5, 3.0  ;;  %v892_v10 = vpop.f32.mrb[7].mxu0 }
 0x2d2   :  { %v368_v11 = vadd.f32 %v754_v9, %v367_v6 }
 0x2d4   :  { %v385_v12 = vpack.c.bf16 %v368_v11, %v368_v11 }
 0x2d6   :  { %910 = vmatmul.mubr.bf16.vlgmr.msra.gmra.mrb[4].mxu1 %v385_v12 }
 0x2d7   :  { %949 = vmatprep.mubr.msk.bf16.mxu1 %vm1038_vm0, %v1037_v0  ;;  %934 = vmatpush3.bf16.msra.mxu1 %v998_v13 }
 0x2d8   :  { %935 = vmatprep.subr.bf16.mxu1 %v1037_v0 }
 0x2db   :  { %936 = vmatpush3.bf16.msra.mxu1 %v999_v16 }
 0x2dc   :  { %937 = vmatprep.subr.bf16.mxu1 %v1037_v0 }
 0x2df   :  { %938 = vmatpush3.bf16.msra.mxu1 %v1000_v17 }
 0x2e0   :  { %939 = vmatprep.subr.bf16.mxu1 %v1037_v0 }
 0x2e3   :  { %940 = vmatpush3.bf16.msra.mxu1 %v1001_v18 }
 0x2e4   :  { %941 = vmatprep.subr.bf16.mxu1 %v1037_v0 }
 0x2e7   :  { %942 = vmatpush3.bf16.msra.mxu1 %v1002_v19 }
 0x2e8   :  { %943 = vmatprep.subr.bf16.mxu1 %v1037_v0 }
 0x2eb   :  { %944 = vmatpush3.bf16.msra.mxu1 %v1003_v20 }
 0x2ec   :  { %945 = vmatprep.subr.bf16.mxu1 %v1037_v0 }
 0x2ef   :  { %946 = vmatpush3.bf16.msra.mxu1 %v1004_v37 }
 0x2f0   :  { %947 = vmatprep.subr.bf16.mxu1 %v1037_v0  ;;  %v711_v0 = vrot.slane %v1148_v1, %v51_v25 }
 0x2f3   :  { %948 = vmatpush3.bf16.msra.mxu1 %v1005_v38 }
 0x3a9   :  { %v472_v28 = vpop.f32.mrb[4].mxu1 }
 0x3aa   :  { %v473_v29 = vadd.f32 %v472_v28, %v389_v22  ;;  %v911_v31 = vpop.f32.mrb[5].mxu1 }
 0x3ab   :  { %v475_v32 = vpop.f32.mrb[6].mxu1 }
 0x3ac   :  { %v482_v33 = vmax.f32 %v473_v29, %v481_v27  ;;  %v912_v34 = vpop.f32.mrb[7].mxu1 }
 0x3ae   :  { %v487_v35 = vmin.f32 %v482_v33, %v486_v30 }
 0x3b0   :  { %v504_v36 = vpack.c.bf16 %v487_v35, %v487_v35 }
 0x3b2   :  { %930 = vmatmul.mubr.bf16.vlgmr.msra.gmra.mrb[8].mxu0 %v504_v36 }
 0x485   :  { %v591_v41 = vpop.f32.mrb[8].mxu0 }
 0x486   :  { %v592_v42 = vadd.f32 %v591_v41, %v508_v40  ;;  %v931_v43 = vpop.f32.mrb[9].mxu0 }
 0x487   :  { %v594_v44 = vpop.f32.mrb[10].mxu0 }
 0x488   :  { %v597_v46 = vmax.f32 %v592_v42, %v481_v27  ;;  %v932_v47 = vpop.f32.mrb[11].mxu0 }
 0x48a   :  { %v598_v48 = vmin.f32 %v597_v46, %v486_v30 }
 0x48c   :  { %v615_v49 = vpack.c.bf16 %v598_v48, %v598_v48 }
 0x48e   :  { %950 = vmatmul.mubr.bf16.vlgmr.msra.gmra.mrb[8].mxu1 %v615_v49 }
 0x561   :  { %v702_v52 = vpop.f32.mrb[8].mxu1 }
 0x562   :  { %v703_v53 = vadd.f32 %v702_v52, %v619_v51  ;;  %v951_v55 = vpop.f32.mrb[9].mxu1 }
 0x563   :  { %v705_v56 = vpop.f32.mrb[10].mxu1 }
 0x564   :  { %v712_v58 = vmax.f32 %v703_v53, %v711_v0  ;;  %v952_v59 = vpop.f32.mrb[11].mxu1 }
 0x566   :  { %v717_v60 = vmin.f32 %v712_v58, %v716_v54 }
 0x568   :  { %v722_v26 = vmul.f32 %v721_v57, %v717_v60 }
 0x56a   :  { %v723_v61 = vadd.f32 %v754_v9, %v722_v26 }
 0x56c   :  { %724 = vst [vmem:[%s1196_s3] sm:$0x3] %v723_v61 }
 0x56d   :  { %729 = vsyncpa [#allocation3], 1 }

</bundles_post_ra>
